<compile_context>
chip_gen: v5e
topology: v5e:2x2
jax: 0.10.0
libtpu: 0.0.40
codegen_flags: <defaults>
</compile_context>

<pallas_src>
import functools
import math

import jax
import jax.numpy as jnp
from jax import lax
from jax.experimental import pallas as pl
from jax.experimental.pallas import tpu as pltpu

LN_EPS = 1e-12


def _round_up(x, m):
    return ((x + m - 1) // m) * m


def _bert_embeddings_kernel(x_ref, w_ref, p_ref, o_ref, *, hidden):
    # Linear: native-dtype operands straight into the MXU, f32 accumulation.
    h = jnp.dot(x_ref[...], w_ref[...], preferred_element_type=jnp.float32)

    bias = p_ref[0:1, :]    # (1, Hp) f32, pre-cast on host
    gamma = p_ref[1:2, :]
    beta = p_ref[2:3, :]
    h = h + bias            # padded lanes stay exactly 0 (W columns and bias padding are 0)

    # LayerNorm over the real `hidden` features. Padded lanes contribute 0 to both sums,
    # so dividing by the true hidden size gives exact statistics.
    inv_h = 1.0 / hidden
    mean = jnp.sum(h, axis=-1, keepdims=True) * inv_h
    mean_sq = jnp.sum(h * h, axis=-1, keepdims=True) * inv_h
    var = mean_sq - mean * mean
    normed = (h - mean) * lax.rsqrt(var + LN_EPS)
    out = normed * gamma + beta   # padded gamma/beta are 0 -> padded lanes write 0

    # Dropout (eval mode) == identity.
    # TODO(synk): training-mode dropout (pltpu.prng_seed/prng_random_bits mask + 1/(1-p) scale).
    o_ref[...] = out.astype(o_ref.dtype)


def bert_embeddings(x, w, b, gamma, beta, *, tile_rows=512):
    """Fused Linear -> LayerNorm -> Dropout(eval), matching BertEmbeddings.forward.

    x: (..., in_dim)    w: (hidden, in_dim)  (PyTorch Linear layout)
    b, gamma, beta: (hidden,)
    tile_rows: row-tile tuning knob. For realistic BERT row counts keep it a large
    multiple of 128 (256-granule friendly on v6e/v7x); halve it on v7x if hidden is
    large enough that double-buffered tiles approach the 64 MiB VMEM.
    """
    in_dim = x.shape[-1]
    hidden = w.shape[0]
    lead_shape = x.shape[:-1]
    rows = int(math.prod(lead_shape)) if lead_shape else 1
    x2d = x.reshape(rows, in_dim)

    # --- choose row tile: multiple of 8; keep grid length >= 2 when possible ---
    rows_aligned = _round_up(rows, 8)
    tm = min(_round_up(tile_rows, 8), rows_aligned)
    if rows_aligned // tm < 2 and tm >= 16:
        tm = _round_up(tm // 2, 8)
    rows_p = _round_up(rows_aligned, tm)
    grid = (rows_p // tm,)

    # --- pad rows (zeros) and hidden (lane-dense multiple of 128) on the host ---
    hidden_p = _round_up(hidden, 128)
    if rows_p != rows:
        x2d = jnp.pad(x2d, ((0, rows_p - rows), (0, 0)))
    w_t = jnp.pad(w.T, ((0, 0), (0, hidden_p - hidden)))            # (in_dim, Hp), native dtype
    params = jnp.stack([
        jnp.pad(b.astype(jnp.float32), (0, hidden_p - hidden)),
        jnp.pad(gamma.astype(jnp.float32), (0, hidden_p - hidden)),
        jnp.pad(beta.astype(jnp.float32), (0, hidden_p - hidden)),
    ])                                                              # (3, Hp) f32

    kernel = functools.partial(_bert_embeddings_kernel, hidden=hidden)
    out = pl.pallas_call(
        kernel,
        out_shape=jax.ShapeDtypeStruct((rows_p, hidden_p), x.dtype),
        grid_spec=pltpu.PrefetchScalarGridSpec(
            num_scalar_prefetch=0,
            grid=grid,
            in_specs=[
                pl.BlockSpec((tm, in_dim), lambda i: (i, 0)),
                pl.BlockSpec((in_dim, hidden_p), lambda i: (0, 0)),   # resident weight
                pl.BlockSpec((3, hidden_p), lambda i: (0, 0)),        # fused bias/gamma/beta
            ],
            out_specs=pl.BlockSpec((tm, hidden_p), lambda i: (i, 0)),
        ),
        compiler_params=pltpu.CompilerParams(
            dimension_semantics=("parallel",),
            vmem_limit_bytes=48 * 1024 * 1024,
        ),
    )(x2d, w_t, params)

    return out[:rows, :hidden].reshape(*lead_shape, hidden)


def reference(x, w, b, gamma, beta):
    h = x.astype(jnp.float32) @ w.astype(jnp.float32).T + b.astype(jnp.float32)
    mean = jnp.mean(h, axis=-1, keepdims=True)
    var = jnp.mean((h - mean) ** 2, axis=-1, keepdims=True)
    normed = (h - mean) / jnp.sqrt(var + LN_EPS)
    return normed * gamma + beta


if __name__ == "__main__":
    in_dim, hidden = 16, 32
    key = jax.random.PRNGKey(0)
    k_x, k_w, k_b, k_g, k_beta, k_x2 = jax.random.split(key, 6)

    # Deterministic parameters (PyTorch Linear (out, in) layout; LN affine slightly perturbed).
    bound = 1.0 / math.sqrt(in_dim)
    w = jax.random.uniform(k_w, (hidden, in_dim), minval=-bound, maxval=bound)
    b = jax.random.uniform(k_b, (hidden,), minval=-bound, maxval=bound)
    gamma = jnp.ones((hidden,), jnp.float32) + 0.01 * jax.random.normal(k_g, (hidden,))
    beta = 0.01 * jax.random.normal(k_beta, (hidden,))

    # Case 1: batch=2, seq=8 (rows divide evenly; grid splits into 2 tiles).
    x1 = jax.random.normal(k_x, (2, 8, in_dim), dtype=jnp.float32)
    out1 = jax.block_until_ready(bert_embeddings(x1, w, b, gamma, beta))
    ref1 = reference(x1, w, b, gamma, beta)
    assert out1.shape == (2, 8, hidden)
    assert jnp.allclose(out1, ref1, atol=1e-5, rtol=1e-5), "case1 mismatch vs reference"

    # Case 2: ragged rows (batch=3, seq=5 -> 15 rows) exercising the padded tail tile.
    x2 = jax.random.normal(k_x2, (3, 5, in_dim), dtype=jnp.float32)
    out2 = jax.block_until_ready(bert_embeddings(x2, w, b, gamma, beta))
    ref2 = reference(x2, w, b, gamma, beta)
    assert out2.shape == (3, 5, hidden)
    assert jnp.allclose(out2, ref2, atol=1e-5, rtol=1e-5), "case2 mismatch vs reference"

    print("KERNEL_OK")
</pallas_src>

<mosaic_0001>
module attributes {stable_mosaic.version = 11 : i64} {
  func.func @_bert_embeddings_kernel(%arg0: i32, %arg1: memref<8x16xf32, #tpu.memory_space<vmem>>, %arg2: memref<16x128xf32, #tpu.memory_space<vmem>>, %arg3: memref<3x128xf32, #tpu.memory_space<vmem>>, %arg4: memref<8x128xf32, #tpu.memory_space<vmem>>) attributes {dimension_semantics = [#tpu.dimension_semantics<parallel>], iteration_bounds = array<i64: 2>, scalar_prefetch = 0 : i64, scratch_operands = 0 : i64, tpu.core_type = #tpu.core_type<tc>, window_params = [{transform_indices = @transform_0, window_bounds = array<i64: 8, 16>}, {pipeline_mode = #tpu.pipeline_mode<synchronous>, transform_indices = @transform_1, window_bounds = array<i64: 16, 128>}, {pipeline_mode = #tpu.pipeline_mode<synchronous>, transform_indices = @transform_2, window_bounds = array<i64: 3, 128>}, {transform_indices = @transform_3, window_bounds = array<i64: 8, 128>}]} {
    %c0 = arith.constant 0 : index
    %c0_0 = arith.constant 0 : index
    %0 = vector.load %arg1[%c0, %c0_0] : memref<8x16xf32, #tpu.memory_space<vmem>>, vector<8x16xf32>
    %c0_1 = arith.constant 0 : index
    %c0_2 = arith.constant 0 : index
    %1 = vector.load %arg2[%c0_1, %c0_2] : memref<16x128xf32, #tpu.memory_space<vmem>>, vector<16x128xf32>
    %cst = arith.constant dense<0.000000e+00> : vector<8x128xf32>
    %2 = tpu.matmul %0, %1, %cst {dimension_numbers = #tpu.dot_dimension_numbers<[1], [0], [0], [1], [0, 0, 1, 1], [], []>} : vector<8x16xf32>, vector<16x128xf32>, vector<8x128xf32> -> vector<8x128xf32>
    %c0_3 = arith.constant 0 : index
    %c0_4 = arith.constant 0 : index
    %3 = vector.load %arg3[%c0_3, %c0_4] : memref<3x128xf32, #tpu.memory_space<vmem>>, vector<1x128xf32>
    %c1 = arith.constant 1 : index
    %c0_5 = arith.constant 0 : index
    %4 = vector.load %arg3[%c1, %c0_5] : memref<3x128xf32, #tpu.memory_space<vmem>>, vector<1x128xf32>
    %c2 = arith.constant 2 : index
    %c0_6 = arith.constant 0 : index
    %5 = vector.load %arg3[%c2, %c0_6] : memref<3x128xf32, #tpu.memory_space<vmem>>, vector<1x128xf32>
    %6 = vector.broadcast %3 : vector<1x128xf32> to vector<8x128xf32>
    %7 = arith.addf %2, %6 : vector<8x128xf32>
    %cst_7 = arith.constant dense<0.000000e+00> : vector<8xf32>
    %8 = vector.multi_reduction <add>, %7, %cst_7 [1] : vector<8x128xf32> to vector<8xf32>
    %9 = vector.shape_cast %8 : vector<8xf32> to vector<8x1xf32>
    %cst_8 = arith.constant 3.125000e-02 : f32
    %10 = vector.broadcast %cst_8 : f32 to vector<8x1xf32>
    %11 = arith.mulf %9, %10 : vector<8x1xf32>
    %12 = arith.mulf %7, %7 : vector<8x128xf32>
    %cst_9 = arith.constant dense<0.000000e+00> : vector<8xf32>
    %13 = vector.multi_reduction <add>, %12, %cst_9 [1] : vector<8x128xf32> to vector<8xf32>
    %14 = vector.shape_cast %13 : vector<8xf32> to vector<8x1xf32>
    %cst_10 = arith.constant 3.125000e-02 : f32
    %15 = vector.broadcast %cst_10 : f32 to vector<8x1xf32>
    %16 = arith.mulf %14, %15 : vector<8x1xf32>
    %17 = arith.mulf %11, %11 : vector<8x1xf32>
    %18 = arith.subf %16, %17 : vector<8x1xf32>
    %19 = vector.broadcast %11 : vector<8x1xf32> to vector<8x128xf32>
    %20 = arith.subf %7, %19 : vector<8x128xf32>
    %cst_11 = arith.constant 9.99999996E-13 : f32
    %21 = vector.broadcast %cst_11 : f32 to vector<8x1xf32>
    %22 = arith.addf %18, %21 : vector<8x1xf32>
    %23 = math.rsqrt %22 : vector<8x1xf32>
    %24 = vector.broadcast %23 : vector<8x1xf32> to vector<8x128xf32>
    %25 = arith.mulf %20, %24 : vector<8x128xf32>
    %26 = vector.broadcast %4 : vector<1x128xf32> to vector<8x128xf32>
    %27 = arith.mulf %25, %26 : vector<8x128xf32>
    %28 = vector.broadcast %5 : vector<1x128xf32> to vector<8x128xf32>
    %29 = arith.addf %27, %28 : vector<8x128xf32>
    %c0_12 = arith.constant 0 : index
    %c0_13 = arith.constant 0 : index
    %30 = vector.load %arg4[%c0_12, %c0_13] : memref<8x128xf32, #tpu.memory_space<vmem>>, vector<8x128xf32>
    tpu.vector_store %arg4[%c0_12, %c0_13], %29 {strides = array<i32>} : memref<8x128xf32, #tpu.memory_space<vmem>>, vector<8x128xf32>,
    return
  }
  func.func @transform_0(%arg0: i32) -> (i32, i32) {
    %c0_i32 = arith.constant 0 : i32
    %c0_i32_0 = arith.constant 0 : i32
    return %arg0, %c0_i32 : i32, i32
  }
  func.func @transform_1(%arg0: i32) -> (i32, i32) {
    %c0_i32 = arith.constant 0 : i32
    %c0_i32_0 = arith.constant 0 : i32
    %c0_i32_1 = arith.constant 0 : i32
    return %c0_i32, %c0_i32_0 : i32, i32
  }
  func.func @transform_2(%arg0: i32) -> (i32, i32) {
    %c0_i32 = arith.constant 0 : i32
    %c0_i32_0 = arith.constant 0 : i32
    %c0_i32_1 = arith.constant 0 : i32
    return %c0_i32, %c0_i32_0 : i32, i32
  }
  func.func @transform_3(%arg0: i32) -> (i32, i32) {
    %c0_i32 = arith.constant 0 : i32
    %c0_i32_0 = arith.constant 0 : i32
    return %arg0, %c0_i32 : i32, i32
  }
}

</mosaic_0001>

<bundles_post_ra>
// kernel: tpu_custom_call.1
= control target key start
LH: loop header
LB: loop body
LE: loop exit
PB: predicated region body
PF: predicated region fallthrough
CT: control target
= control target key end

     0   :  { %8 = vsyncpa [#allocation3], 0  ;;  %s808_s0 = inlined_call_operand.hbm [shape: f32[16,16], index: 0, kind: input, shape index: {}]   ;;  %s809_s1 = inlined_call_operand.hbm [shape: f32[16,128], index: 1, kind: input, shape index: {}]   ;;  %s810_s2 = inlined_call_operand.hbm [shape: f32[3,128], index: 2, kind: input, shape index: {}]   ;;  %s811_s3 = inlined_call_operand.hbm [shape: f32[16,128], index: 3, kind: output, shape index: {}]  }
   0x1   :  { %10 = vsyncpa [#allocation3 + $0x1], 0 }
   0x2   :  { %11 = vsyncpa [#allocation6], 0 }
   0x3   :  { %12 = vsyncpa [#allocation4], 0 }
   0x4   :  { %14 = vsyncpa [#allocation4 + $0x1], 0  ;;  %s659_s12 = smov 0   ;;  %s661_s13 = smov 0  }
   0x5   :  { %s663_s14 = smov 0   ;;  %s665_s15 = smov 0  }
   0x6 LB: > { %s130_s18 = sshll.u32 %s809_s1, 4  ;;  %s683_s19 = sadd.s32 4294967295, %s633_s15   ;;  %s633_s15 = sphi %s665_s15, %s822_s15   ;;  %s629_s14 = sphi %s663_s14, %s821_s14   ;;  %s625_s13 = sphi %s661_s13, %s820_s13   ;;  %s621_s12 = sphi %s659_s12, %s819_s12   ;;  %s131_s18 = int_to_ptr.hbm [resolvable:$true] %s130_s18 }
   0x7   : > { %p383_p0 = scmp.ge.s32.totalorder %s633_s15, 1  ;;  %p41_p1 = scmp.eq.s32.totalorder %s683_s19, 0 }
   0x8   : > { %p119_p2 = scmp.lt.s32.totalorder %s633_s15, 3  ;;  %s635_s21 = smov [#allocation5]  }
   0x9   : > { %s132_s22 = sshll.u32 %s635_s21, 4  ;;  %s145_s25 = sshll.u32 %s810_s2, 4  ;;  %s133_s22 = int_to_ptr.vmem [resolvable:$true] %s132_s22  ;;  %s146_s25 = int_to_ptr.hbm [resolvable:$true] %s145_s25 }
   0xa   : > { %p688_p3 = pnand %p383_p0, %p119_p2  ;;  %s636_s26 = smov [#allocation7]  }
   0xb   : > { %s147_s27 = sshll.u32 %s636_s26, 4  ;;  %s637_s28 = smov 128   ;;  %s148_s27 = int_to_ptr.vmem [resolvable:$true] %s147_s27 }
   0xc   : > { %p411_p4 = pneg %p688_p3  ;;  %s638_s29 = smov 8  }
   0xd   : > { %s382_s30 = sadd.s32 4294967294, %s633_s15   ;;  %s702_s4 = sadd.s32 1, %s633_s15  }
   0xe   : > { %p412_p6 = pnand %p411_p4, %p41_p1  ;;  %s24_s5 = ssub.s32 %s633_s15, %s702_s4 }
   0xf   : > { %s27_s6 = sadd.s32 1, %s629_s14  ;;  %p25_p7 = scmp.eq.s32.totalorder %s24_s5, 0 }
  0x10   : > { %414 = dma.hbm_to_vmem [thread:$0]  (!%p412_p6), %s131_s18, 256, %s133_s22, [#allocation6], %s637_s28, %s637_s28, %s638_s29  }
  0x11   : > { %417 = dma.hbm_to_vmem [thread:$0]  (!%p412_p6), %s146_s25, 64, %s148_s27, [#allocation6]  }
  0x12   : > { %p34_p8 = scmp.ne.s32.totalorder %s629_s14, %s625_s13  ;;  %p35_p9 = scmp.eq.s32.totalorder %s633_s15, 0 }
  0x13   : > { %p40_p10 = scmp.ne.s32.totalorder %s625_s13, %s621_s12  ;;  %p106_p13 = scmp.eq.s32.totalorder %s683_s19, 1 }
  0x14   : > { %s713_s7 = scalar_select %p25_p7, %s629_s14, %s27_s6  }
  0x15   : > { %p715_p11 = por %p35_p9, %p34_p8  ;;  %p721_p12 = por %p41_p1, %p40_p10 }
  0x16   : > { %p112_p0 = scmp.eq.s32.totalorder %s382_s30, 1  ;;  %p428_p2 = scmp.lt.s32.totalorder %s633_s15, 2 }
  0x17   : > { %s158_s10 = sand.u32 1, %s629_s14   ;;  %p728_p4 = por %p106_p13, %p34_p8 }
  0x18   : > { %p732_p6 = por %p112_p0, %p40_p10  ;;  %s387_s17 = sshll.u32 %s158_s10, 3 }
  0x19   : > { %s388_s18 = sshll.u32 %s633_s15, 3  ;;  %s162_s24 = scalar_lea.vmem [#allocation2], %s387_s17 }
  0x1a   : > { %s166_s23 = scalar_lea.hbm %s808_s0, %s388_s18  ;;  %s170_s25 = sshll.u32 %s162_s24, 4  ;;  %s171_s25 = int_to_ptr.vmem [resolvable:$true] %s170_s25 }
  0x1b   : > { %s168_s26 = sshll.u32 %s166_s23, 4  ;;  %p742_p7 = pnand %p428_p2, %p715_p11  ;;  %s169_s26 = int_to_ptr.hbm [resolvable:$true] %s168_s26 }
  0x1c   : > { %s159_s28 = scalar_lea.sflag [#allocation3], %s158_s10  ;;  %s533_s29 = sshra.s32 %s169_s26, 4  ;;  %s534_s29 = int_to_ptr.hbm [resolvable:$true] %s533_s29 }
  0x1d   : > { %s535_s30 = scalar_lea.hbm %s534_s29, 8  ;;  %p537_p9 = pneg %p742_p7 }
  0x1e   : > { %p536_p8 = scmp.ne.s32.totalorder %s534_s29, %s535_s30  ;;  %s540_s17 = scalar_lea.hbm %s808_s0, 16 }
  0x1f   : > { %p541_p11 = scmp.lt.s32.totalorder %s534_s29, %s808_s0  ;;  %p542_p0 = scmp.lt.s32.totalorder %s540_s17, %s535_s30 }
  0x20   : > { %p538_p10 = pnand %p537_p9, %p536_p8 }
  0x21   : > { %p543_p2 = por %p542_p0, %p541_p11 }
  0x22   : > { %p539_p13 = pneg %p538_p10 }
  0x24   : > { %p544_p5 = pnand %p543_p2, %p539_p13 }
  0x26   : > { %547 = shalt.err (!%p544_p5)
}
  0x27   : > { %421 = dma.hbm_to_vmem [thread:$0]  (!%p742_p7), %s169_s26, 128, %s171_s25, %s159_s28  }
  0x28   : > { %179 = sbr.rel (%p688_p3) target bundleno = 337 (0x151), region = 32  ;;  %s759_s10 = sand.u32 (!%p688_p3), 1, %s625_s13  }
  0x29   : > { %s390_s21 = sshll.u32 (!%p688_p3), %s759_s10, 3  ;;  %s182_s22 = scalar_lea.sflag (!%p688_p3), [#allocation3], %s759_s10 }
  0x2a   : > { %s185_s23 = scalar_lea.vmem (!%p688_p3), [#allocation2], %s390_s21 }
  0x2d   : > { %608 = dma.done.wait (%p721_p12), %s182_s22, 128  }
  0x2e   : > { %610 = vsyncadd (%p721_p12), %s182_s22, 4294967168 }
  0x2f   : > { %612 = dma.done.wait (%p41_p1), [#allocation6], 320  }
  0x30   : > { %614 = vsyncadd (%p41_p1), [#allocation6], 4294966976  ;;  %v221_v0 = vld [vmem:[#allocation5 + $0x8] sm:$0xff]  ;;  %v220_v1 = vld [vmem:[#allocation5] sm:$0xff]  ;;  %vm226_vm0 = vcmask 130048   ;;  %s396_s20 = sshll.u32 %s683_s19, 3 }
  0x31   : > { %244 = vmatpush.msra.mxu0 %v221_v0  ;;  %v219_v2 = vld [vmem:[%s185_s23] sm:$0xff]  ;;  %s288_s25 = scalar_lea.hbm %s811_s3, %s396_s20  ;;  %s218_s26 = scalar_lea.vmem [#allocation8], %s390_s21 }
  0x32   : > { %v468_v3 = vld [vmem:[#allocation7] ss:$0 sm:$0xff]  ;;  %v469_v21 = vld [vmem:[#allocation7 + $0x1] ss:$0 sm:$0xff]  ;;  %v470_v24 = vld [vmem:[#allocation7 + $0x2] ss:$0 sm:$0xff] }
  0x33   : > { %245 = vmatpush.msra.mxu0 %v220_v1  ;;  %s290_s27 = sshll.u32 %s218_s26, 4  ;;  %s292_s28 = sshll.u32 %s288_s25, 4  ;;  %s291_s27 = int_to_ptr.vmem [resolvable:$true] %s290_s27  ;;  %s293_s28 = int_to_ptr.hbm [resolvable:$true] %s292_s28 }
  0x34   : > { %394 = vmatmul.msk.f32.vlgmr.msra.gmra.mxu0 %vm226_vm0, %v219_v2  ;;  %s278_s19 = scalar_lea.sflag [#allocation4], %s759_s10  ;;  %s577_s29 = sshra.s32 %s293_s28, 4  ;;  %s578_s29 = int_to_ptr.hbm [resolvable:$true] %s577_s29 }
  0x35   : > { %s579_s30 = scalar_lea.hbm %s578_s29, 8  ;;  %s583_s17 = scalar_lea.hbm %s811_s3, 16 }
  0x36   : > { %p580_p1 = scmp.ne.s32.totalorder %s578_s29, %s579_s30  ;;  %p584_p12 = scmp.lt.s32.totalorder %s578_s29, %s811_s3 }
  0x37   : > { %p585_p7 = scmp.lt.s32.totalorder %s583_s17, %s579_s30 }
  0x38   : > { %p581_p3 = pnand %p580_p1, %p728_p4 }
  0x39   : > { %p586_p8 = por %p585_p7, %p584_p12 }
  0x3a   : > { %p582_p5 = pneg %p581_p3 }
  0x3c   : > { %p587_p9 = pnand %p586_p8, %p582_p5 }
  0xb1   : > { %v247_v4 = vpop.f32.mrf.mxu0 }
  0xb2   : > { %v248_v5 = vadd.f32 %v468_v3, %v247_v4 }
  0xb4   : > { %250 = vadd.xlane.f32.xlu0 %v248_v5  ;;  %v253_v6 = vmul.f32 %v248_v5, %v248_v5 }
  0xbc   : > { %254 = vadd.xlane.f32.xlu0 %v253_v6 }
 0x127   : > { %v251_v7 = vpop.xlane.xlu0 %250 }
 0x128   : > { %v252_v8 = vmul.f32 0.03125, %v251_v7 }
 0x12a   : > { %v257_v10 = vmul.f32 %v252_v8, %v252_v8  ;;  %v259_v20 = vsub.f32 %v248_v5, %v252_v8 }
 0x12f   : > { %v255_v9 = vpop.xlane.xlu0 %254 }
 0x130   : > { %v256_v11 = vmul.f32 0.03125, %v255_v9 }
 0x132   : > { %v258_v12 = vsub.f32 %v256_v11, %v257_v10 }
 0x134   : > { %v260_v13 = vadd.f32 1e-12, %v258_v12 }
 0x136   : > { %471 = vrsqrt.f32 %v260_v13  ;;  %vm267_vm2 = vweird.f32 %v260_v13 }
 0x13c   : > { %v472_v14 = vpop.eup %471 }
 0x13d   : > { %v262_v15 = vmul.f32 %v472_v14, %v260_v13  ;;  %vm268_vm1 = vweird.f32 %v472_v14 }
 0x13e   : > { %vm269_vm3 = vmor %vm267_vm2, %vm268_vm1 }
 0x13f   : > { %v263_v16 = vmul.f32 %v472_v14, %v262_v15 }
 0x141   : > { %v264_v17 = vmul.f32 0.5, %v263_v16 }
 0x143   : > { %v265_v18 = vsub.f32 1.5, %v264_v17 }
 0x145   : > { %v266_v19 = vmul.f32 %v472_v14, %v265_v18 }
 0x147   : > { %v270_v22 = vsel %vm269_vm3, %v472_v14, %v266_v19 }
 0x148   : > { %v271_v23 = vmul.f32 %v270_v22, %v259_v20 }
 0x14a   : > { %v273_v25 = vmul.f32 %v469_v21, %v271_v23 }
 0x14c   : > { %v275_v26 = vadd.f32 %v470_v24, %v273_v25 }
 0x14e   : > { %276 = vst [vmem:[%s218_s26] sm:$0xff] %v275_v26 }
 0x14f   : > { %590 = shalt.err (!%p587_p9)
}
 0x150   : > { %409 = dma.vmem_to_hbm [thread:$0]  (%p728_p4), %s291_s27, 128, %s293_s28, %s278_s19  }
 0x151 PF: > { %s304_s10 = sand.u32 1, %s621_s12   ;;  %p818_p10 = scmp.ge.s32.totalorder %s633_s15, 2 }
 0x152   : > { %s305_s21 = scalar_lea.sflag [#allocation4], %s304_s10 }
 0x153   : > { %p423_p13 = pnand %p818_p10, %p732_p6 }
 0x155   : > { %p424_p11 = pneg %p423_p13 }
 0x157   : > { %616 = dma.done.wait (%p424_p11), %s305_s21, 128  }
 0x158   : > { %618 = vsyncadd (%p424_p11), %s305_s21, 4294967168  ;;  %p17_p0 = scmp.ge.s32.totalorder %s702_s4, 4   ;;  %s819_s12 = smov %s625_s13 }
 0x159   : > { %s820_s13 = smov %s629_s14  ;;  %s821_s14 = smov %s713_s7 }
 0x15a   : > { %s822_s15 = smov %s702_s4  ;;  %19 = sbr.rel (!%p17_p0) target bundleno = 6 (0x6), region = 85 }
 0x15f   :  { %311 = vsyncpa [#allocation3], 1 }
 0x160   :  { %313 = vsyncpa [#allocation3 + $0x1], 1 }
 0x161   :  { %314 = vsyncpa [#allocation6], 1 }
 0x162   :  { %315 = vsyncpa [#allocation4], 1 }
 0x163   :  { %317 = vsyncpa [#allocation4 + $0x1], 1 }

</bundles_post_ra>
